<compile_context>
chip_gen: v7x
topology: tpu7x:2x2x1
jax: 0.10.0
libtpu: 0.0.40
codegen_flags: <defaults>
</compile_context>

<pallas_src>
import jax
import jax.numpy as jnp
from jax.experimental import pallas as pl
from jax.experimental.pallas import tpu as pltpu


_VPU_MAX_CIN = 16   # VPU path cost scales with C_in (2 VALU ops/ci/vreg); MXU
                    # cost is a step function of K -> cut over on C_in only.


def _conv1x1_kernel(x_ref, w_ref, b_ref, o_ref):
    """out[b] = W @ x[b] + bias, with the batch folded into the block.

    x_ref: (B, C_in, tn)   w_ref: (C_out, C_in)   b_ref: (C_out, 1)
    o_ref: (B, C_out, tn)  -- lane-dense output (last dim = spatial tile)
    """
    bsz, c_in, _ = x_ref.shape
    bias = b_ref[...].astype(jnp.float32)          # (C_out, 1): lane broadcast

    use_vpu = c_in <= _VPU_MAX_CIN                 # static cutover on C_in only
    if use_vpu:
        w32 = w_ref[...].astype(jnp.float32)       # (C_out, C_in), resident

    for b in range(bsz):                           # B is small & static: unrolled
        if use_vpu:
            # Tiny contraction: C_in broadcast-FMAs on the VPU over the
            # lane-dense (C_out, tn) layout; skips the MXU push/pop cadence.
            # TODO(synk): switch to a stride-0 sublane-broadcast ref load
            # (x_ref[b, pl.ds(ci, C_out, stride=0), :]) so the row broadcast
            # rides the idle vector-load slot instead of VALU/XLU work.
            xb = x_ref[b].astype(jnp.float32)      # (C_in, tn)
            acc = w32[:, 0:1] * xb[0:1, :]         # (C_out, tn)
            for ci in range(1, c_in):
                acc = acc + w32[:, ci:ci + 1] * xb[ci:ci + 1, :]
        else:
            # Real channel counts: MXU matmul with f32 accumulation; output
            # stays lane-dense along tn.
            # TODO(synk): for very large C_in add a K grid axis + f32
            # accumulator scratch (pl.when init/finalize) to bound the x tile
            # and pipeline the MXU; VMEM-aware tn capping covers typical sizes.
            acc = jnp.dot(w_ref[...], x_ref[b],
                          preferred_element_type=jnp.float32)
        o_ref[b] = (acc + bias).astype(o_ref.dtype)


def _min_parallel_tiles():
    """2 when the chip has 2 TensorCores sharing the grid (v7x, v4/v5p
    megacore) so a 'parallel' axis can feed both; 1 on single-TC chips
    (v5e/v6e) so one fat grid step replaces a serial loop."""
    try:
        d = jax.devices()[0]
        kind = str(getattr(d, "device_kind", "")).lower()
        if any(tag in kind for tag in ("v7", "v4", "v5p")):
            return 2
        n = getattr(d, "num_cores", None)
        if n is not None and int(n) >= 2:
            return 2
    except Exception:
        pass
    return 1


def _pick_spatial_tile(hw, per_col_bytes, vmem_budget_bytes, min_tiles):
    """Largest spatial tile that (a) divides hw, (b) keeps double-buffered
    x/out tiles under the VMEM working budget, (c) yields >= min_tiles steps.
    Prefers lane-dense multiples of 128 (the largest such divisor is usually
    MXU-native 256-aligned when hw allows)."""
    max_cols = max(int(vmem_budget_bytes // max(per_col_bytes, 1)), 128)
    upper = min(hw, max_cols)
    if min_tiles > 1:
        upper = min(upper, max(hw // min_tiles, 1))
    if upper >= hw and min_tiles <= 1:
        return hw                      # full extent: always a legal block shape
    t = (upper // 128) * 128
    while t >= 128:
        if hw % t == 0:
            return t
        t -= 128
    # Small or awkward hw: fall back to the full extent (always a legal block
    # shape).  For hw < 128 stores degrade to masked vst.msk; acceptable.
    # TODO(synk): very large hw with no multiple-of-128 divisor would want a
    # masked ragged tail tile instead of one oversized full-extent block.
    return hw


def simple_conv2d_forward(x_nchw, weight, bias, *,
                          vmem_working_budget_bytes=20 * (1 << 20)):
    """x_nchw: (B, C_in, H, W); weight: (C_out, C_in); bias: (C_out,)."""
    B, C_in, H, W = x_nchw.shape
    C_out = weight.shape[0]
    HW = H * W
    itemsize = jnp.dtype(x_nchw.dtype).itemsize

    x3 = x_nchw.reshape(B, C_in, HW)        # free reshape (no transpose)
    b_col = bias.reshape(C_out, 1)          # column -> plain lane-broadcast add

    # Batch folded into the block; spatial axis tiled lane-dense & 'parallel'.
    # TODO(synk): for very large B, move batch back onto the grid instead of
    # growing the block beyond the VMEM budget.
    min_tiles = _min_parallel_tiles()
    per_col_bytes = 2 * B * (C_in + C_out) * itemsize      # double-buffered x+out
    tn = _pick_spatial_tile(HW, per_col_bytes, vmem_working_budget_bytes, min_tiles)
    num_tiles = max(HW // tn, 1)
    grid = (num_tiles,)

    # Explicit VMEM limit: computed need + headroom, clamped to a range that is
    # safe on every chip (>= v5e's 16 MiB default scope, <= v7x's 64 MiB).
    w_bytes = int(weight.size) * jnp.dtype(weight.dtype).itemsize
    b_bytes = int(bias.size) * jnp.dtype(bias.dtype).itemsize
    need = per_col_bytes * tn + 2 * w_bytes + 2 * b_bytes
    vmem_limit = int(min(max(need * 2 + (2 << 20), 16 << 20), 32 << 20))

    # Resident weight: constant index_map; single-buffer it only when it is
    # large enough for the saved VMEM copy to matter (keeps the tiny tested
    # shape on the default pipeline path).
    w_mode = dict(pipeline_mode=pl.Buffered(1)) if w_bytes >= (1 << 20) else {}

    out3 = pl.pallas_call(
        _conv1x1_kernel,
        out_shape=jax.ShapeDtypeStruct((B, C_out, HW), x_nchw.dtype),
        grid_spec=pltpu.PrefetchScalarGridSpec(
            num_scalar_prefetch=0,
            grid=grid,
            in_specs=[
                pl.BlockSpec((B, C_in, tn), lambda n: (0, 0, n)),
                pl.BlockSpec((C_out, C_in), lambda n: (0, 0), **w_mode),
                pl.BlockSpec((C_out, 1), lambda n: (0, 0)),
            ],
            out_specs=pl.BlockSpec((B, C_out, tn), lambda n: (0, 0, n)),
        ),
        compiler_params=pltpu.CompilerParams(
            dimension_semantics=("parallel",),
            vmem_limit_bytes=vmem_limit,
        ),
    )(x3, weight, b_col)

    return out3.reshape(B, C_out, H, W)     # free reshape back to NCHW


if __name__ == "__main__":
    # Small shapes consistent with the module: B=2, C_in=4, H=W=16, C_out=8
    B, C_in, H, W = 2, 4, 16, 16
    C_out = 8

    key = jax.random.PRNGKey(0)
    kx, kw, kb = jax.random.split(key, 3)

    x = jax.random.normal(kx, (B, C_in, H, W), dtype=jnp.float32)

    # Deterministic Kaiming-like init for the 1x1 conv (fan_in = C_in * 1 * 1)
    fan_in = C_in
    weight = jax.random.normal(kw, (C_out, C_in), dtype=jnp.float32) * jnp.sqrt(2.0 / fan_in)
    bias = jax.random.normal(kb, (C_out,), dtype=jnp.float32) * 0.01

    out = simple_conv2d_forward(x, weight, bias)
    out = jax.block_until_ready(out)

    # Cross-check against a plain-JAX reference (1x1 conv == channel contraction).
    ref = jnp.einsum("oc,bchw->bohw", weight, x,
                     precision=jax.lax.Precision.HIGHEST) + bias[None, :, None, None]
    assert out.shape == (B, C_out, H, W)
    assert jnp.allclose(out, ref, atol=2e-5, rtol=1e-5), float(jnp.max(jnp.abs(out - ref)))

    print("KERNEL_OK")
</pallas_src>

<mosaic_0001>
module attributes {stable_mosaic.version = 11 : i64} {
  func.func @_conv1x1_kernel(%arg0: i32, %arg1: memref<2x4x256xf32, #tpu.memory_space<vmem>>, %arg2: memref<8x4xf32, #tpu.memory_space<vmem>>, %arg3: memref<8x1xf32, #tpu.memory_space<vmem>>, %arg4: memref<2x8x256xf32, #tpu.memory_space<vmem>>) attributes {dimension_semantics = [#tpu.dimension_semantics<parallel>], iteration_bounds = array<i64: 1>, scalar_prefetch = 0 : i64, scratch_operands = 0 : i64, tpu.core_type = #tpu.core_type<tc>, window_params = [{transform_indices = @transform_0, window_bounds = array<i64: 2, 4, 256>}, {pipeline_mode = #tpu.pipeline_mode<synchronous>, transform_indices = @transform_1, window_bounds = array<i64: 8, 4>}, {pipeline_mode = #tpu.pipeline_mode<synchronous>, transform_indices = @transform_2, window_bounds = array<i64: 8, 1>}, {transform_indices = @transform_3, window_bounds = array<i64: 2, 8, 256>}]} {
    %c0 = arith.constant 0 : index
    %c0_0 = arith.constant 0 : index
    %0 = vector.load %arg3[%c0, %c0_0] : memref<8x1xf32, #tpu.memory_space<vmem>>, vector<8x1xf32>
    %c0_1 = arith.constant 0 : index
    %c0_2 = arith.constant 0 : index
    %1 = vector.load %arg2[%c0_1, %c0_2] : memref<8x4xf32, #tpu.memory_space<vmem>>, vector<8x4xf32>
    %c0_3 = arith.constant 0 : index
    %c0_4 = arith.constant 0 : index
    %c0_5 = arith.constant 0 : index
    %2 = vector.load %arg1[%c0_3, %c0_4, %c0_5] : memref<2x4x256xf32, #tpu.memory_space<vmem>>, vector<1x4x256xf32>
    %3 = vector.shape_cast %2 : vector<1x4x256xf32> to vector<4x256xf32>
    %4 = vector.extract_strided_slice %1 {offsets = [0, 0], sizes = [8, 1], strides = [1, 1]} : vector<8x4xf32> to vector<8x1xf32>
    %5 = vector.extract_strided_slice %3 {offsets = [0, 0], sizes = [1, 256], strides = [1, 1]} : vector<4x256xf32> to vector<1x256xf32>
    %6 = vector.broadcast %4 : vector<8x1xf32> to vector<8x256xf32>
    %7 = vector.broadcast %5 : vector<1x256xf32> to vector<8x256xf32>
    %8 = arith.mulf %6, %7 : vector<8x256xf32>
    %9 = vector.extract_strided_slice %1 {offsets = [0, 1], sizes = [8, 1], strides = [1, 1]} : vector<8x4xf32> to vector<8x1xf32>
    %10 = vector.extract_strided_slice %3 {offsets = [1, 0], sizes = [1, 256], strides = [1, 1]} : vector<4x256xf32> to vector<1x256xf32>
    %11 = vector.broadcast %9 : vector<8x1xf32> to vector<8x256xf32>
    %12 = vector.broadcast %10 : vector<1x256xf32> to vector<8x256xf32>
    %13 = arith.mulf %11, %12 : vector<8x256xf32>
    %14 = arith.addf %8, %13 : vector<8x256xf32>
    %15 = vector.extract_strided_slice %1 {offsets = [0, 2], sizes = [8, 1], strides = [1, 1]} : vector<8x4xf32> to vector<8x1xf32>
    %16 = vector.extract_strided_slice %3 {offsets = [2, 0], sizes = [1, 256], strides = [1, 1]} : vector<4x256xf32> to vector<1x256xf32>
    %17 = vector.broadcast %15 : vector<8x1xf32> to vector<8x256xf32>
    %18 = vector.broadcast %16 : vector<1x256xf32> to vector<8x256xf32>
    %19 = arith.mulf %17, %18 : vector<8x256xf32>
    %20 = arith.addf %14, %19 : vector<8x256xf32>
    %21 = vector.extract_strided_slice %1 {offsets = [0, 3], sizes = [8, 1], strides = [1, 1]} : vector<8x4xf32> to vector<8x1xf32>
    %22 = vector.extract_strided_slice %3 {offsets = [3, 0], sizes = [1, 256], strides = [1, 1]} : vector<4x256xf32> to vector<1x256xf32>
    %23 = vector.broadcast %21 : vector<8x1xf32> to vector<8x256xf32>
    %24 = vector.broadcast %22 : vector<1x256xf32> to vector<8x256xf32>
    %25 = arith.mulf %23, %24 : vector<8x256xf32>
    %26 = arith.addf %20, %25 : vector<8x256xf32>
    %27 = vector.broadcast %0 : vector<8x1xf32> to vector<8x256xf32>
    %28 = arith.addf %26, %27 : vector<8x256xf32>
    %c0_6 = arith.constant 0 : index
    %c0_7 = arith.constant 0 : index
    %c0_8 = arith.constant 0 : index
    %29 = vector.load %arg4[%c0_6, %c0_7, %c0_8] : memref<2x8x256xf32, #tpu.memory_space<vmem>>, vector<1x8x256xf32>
    %30 = vector.shape_cast %29 : vector<1x8x256xf32> to vector<8x256xf32>
    %31 = vector.shape_cast %28 : vector<8x256xf32> to vector<1x8x256xf32>
    tpu.vector_store %arg4[%c0_6, %c0_7, %c0_8], %31 {strides = array<i32>} : memref<2x8x256xf32, #tpu.memory_space<vmem>>, vector<1x8x256xf32>,
    %c1 = arith.constant 1 : index
    %c0_9 = arith.constant 0 : index
    %c0_10 = arith.constant 0 : index
    %32 = vector.load %arg1[%c1, %c0_9, %c0_10] : memref<2x4x256xf32, #tpu.memory_space<vmem>>, vector<1x4x256xf32>
    %33 = vector.shape_cast %32 : vector<1x4x256xf32> to vector<4x256xf32>
    %34 = vector.extract_strided_slice %1 {offsets = [0, 0], sizes = [8, 1], strides = [1, 1]} : vector<8x4xf32> to vector<8x1xf32>
    %35 = vector.extract_strided_slice %33 {offsets = [0, 0], sizes = [1, 256], strides = [1, 1]} : vector<4x256xf32> to vector<1x256xf32>
    %36 = vector.broadcast %34 : vector<8x1xf32> to vector<8x256xf32>
    %37 = vector.broadcast %35 : vector<1x256xf32> to vector<8x256xf32>
    %38 = arith.mulf %36, %37 : vector<8x256xf32>
    %39 = vector.extract_strided_slice %1 {offsets = [0, 1], sizes = [8, 1], strides = [1, 1]} : vector<8x4xf32> to vector<8x1xf32>
    %40 = vector.extract_strided_slice %33 {offsets = [1, 0], sizes = [1, 256], strides = [1, 1]} : vector<4x256xf32> to vector<1x256xf32>
    %41 = vector.broadcast %39 : vector<8x1xf32> to vector<8x256xf32>
    %42 = vector.broadcast %40 : vector<1x256xf32> to vector<8x256xf32>
    %43 = arith.mulf %41, %42 : vector<8x256xf32>
    %44 = arith.addf %38, %43 : vector<8x256xf32>
    %45 = vector.extract_strided_slice %1 {offsets = [0, 2], sizes = [8, 1], strides = [1, 1]} : vector<8x4xf32> to vector<8x1xf32>
    %46 = vector.extract_strided_slice %33 {offsets = [2, 0], sizes = [1, 256], strides = [1, 1]} : vector<4x256xf32> to vector<1x256xf32>
    %47 = vector.broadcast %45 : vector<8x1xf32> to vector<8x256xf32>
    %48 = vector.broadcast %46 : vector<1x256xf32> to vector<8x256xf32>
    %49 = arith.mulf %47, %48 : vector<8x256xf32>
    %50 = arith.addf %44, %49 : vector<8x256xf32>
    %51 = vector.extract_strided_slice %1 {offsets = [0, 3], sizes = [8, 1], strides = [1, 1]} : vector<8x4xf32> to vector<8x1xf32>
    %52 = vector.extract_strided_slice %33 {offsets = [3, 0], sizes = [1, 256], strides = [1, 1]} : vector<4x256xf32> to vector<1x256xf32>
    %53 = vector.broadcast %51 : vector<8x1xf32> to vector<8x256xf32>
    %54 = vector.broadcast %52 : vector<1x256xf32> to vector<8x256xf32>
    %55 = arith.mulf %53, %54 : vector<8x256xf32>
    %56 = arith.addf %50, %55 : vector<8x256xf32>
    %57 = vector.broadcast %0 : vector<8x1xf32> to vector<8x256xf32>
    %58 = arith.addf %56, %57 : vector<8x256xf32>
    %c1_11 = arith.constant 1 : index
    %c0_12 = arith.constant 0 : index
    %c0_13 = arith.constant 0 : index
    %59 = vector.load %arg4[%c1_11, %c0_12, %c0_13] : memref<2x8x256xf32, #tpu.memory_space<vmem>>, vector<1x8x256xf32>
    %60 = vector.shape_cast %59 : vector<1x8x256xf32> to vector<8x256xf32>
    %61 = vector.shape_cast %58 : vector<8x256xf32> to vector<1x8x256xf32>
    tpu.vector_store %arg4[%c1_11, %c0_12, %c0_13], %61 {strides = array<i32>} : memref<2x8x256xf32, #tpu.memory_space<vmem>>, vector<1x8x256xf32>,
    return
  }
  func.func @transform_0(%arg0: i32) -> (i32, i32, i32) {
    %c0_i32 = arith.constant 0 : i32
    %c0_i32_0 = arith.constant 0 : i32
    %c0_i32_1 = arith.constant 0 : i32
    return %c0_i32, %c0_i32_0, %arg0 : i32, i32, i32
  }
  func.func @transform_1(%arg0: i32) -> (i32, i32) {
    %c0_i32 = arith.constant 0 : i32
    %c0_i32_0 = arith.constant 0 : i32
    %c0_i32_1 = arith.constant 0 : i32
    return %c0_i32, %c0_i32_0 : i32, i32
  }
  func.func @transform_2(%arg0: i32) -> (i32, i32) {
    %c0_i32 = arith.constant 0 : i32
    %c0_i32_0 = arith.constant 0 : i32
    %c0_i32_1 = arith.constant 0 : i32
    return %c0_i32, %c0_i32_0 : i32, i32
  }
  func.func @transform_3(%arg0: i32) -> (i32, i32, i32) {
    %c0_i32 = arith.constant 0 : i32
    %c0_i32_0 = arith.constant 0 : i32
    %c0_i32_1 = arith.constant 0 : i32
    return %c0_i32, %c0_i32_0, %arg0 : i32, i32, i32
  }
}

</mosaic_0001>

<bundles_post_ra>
// kernel: tpu_custom_call.1
= control target key start
LH: loop header
LB: loop body
LE: loop exit
PB: predicated region body
PF: predicated region fallthrough
CT: control target
= control target key end

     0   :  { %v279_v1 = vmov 0   ;;  %v280_v2 = vmov 2   ;;  %s330_s0 = inlined_call_operand.vmem [shape: f32[2,4,256], index: 0, kind: input, shape index: {}]   ;;  %s331_s1 = inlined_call_operand.vmem [shape: f32[8,4], index: 1, kind: input, shape index: {}]   ;;  %s332_s2 = inlined_call_operand.vmem [shape: f32[8,1], index: 2, kind: input, shape index: {}]   ;;  %s333_s3 = inlined_call_operand.hbm [shape: f32[2,8,256], index: 3, kind: output, shape index: {}]  }
   0x1   :  { %v16_v0 = vld [vmem:[%s331_s1] sm:$0xff]  ;;  %249 = vset.pattern.permute.xlu0 %v279_v1  ;;  %251 = vset.pattern.permute.xlu1 %v280_v2 }
   0x2   :  { %8 = vsyncpa [#allocation3], 0  ;;  %20 = vperm.xlu0 %249, %v16_v0   ;;  %71 = vperm.xlu1 %251, %v16_v0   ;;  %v281_v3 = vmov 1   ;;  %v282_v4 = vmov 3   ;;  %v15_v5 = vld [vmem:[%s332_s2] sm:$0xff]  ;;  %v24_v6 = vlaneseq  ;;  %v241_v11 = vld [vmem:[%s330_s0 + $0x8] sm:$0xff] }
   0x3   :  { %v17_v10 = vld [vmem:[%s330_s0] sm:$0xff]  ;;  %s283_s0 = smov [#allocation2]  }
   0x4   :  { %v25_v7 = vshrl.u32 %v24_v6, 7  ;;  %s230_s2 = sshll.u32 %s283_s0, 4  ;;  %s231_s2 = int_to_ptr.vmem [resolvable:$true] %s230_s2 }
   0x5   :  { %s255_s19 = scalar_lea.vmem %s231_s2, 512  ;;  %p260_p1 = scmp.lt.s32.totalorder %s231_s2, %s231_s2 }
   0x6   :  { %250 = vset.pattern.permute.xlu0 %v281_v3  ;;  %252 = vset.pattern.permute.xlu1 %v282_v4  ;;  %v26_v8 = vsub.s32 0, %v25_v7  ;;  %v30_v9 = vsub.s32 4, %v25_v7  ;;  %v76_v12 = vsub.s32 2, %v25_v7  ;;  %v80_v13 = vsub.s32 6, %v25_v7  ;;  %p256_p0 = scmp.ne.s32.totalorder %s231_s2, %s255_s19  ;;  %p261_p2 = scmp.lt.s32.totalorder %s255_s19, %s255_s19 }
   0x7   :  { %45 = vperm.xlu0 %250, %v16_v0   ;;  %97 = vperm.xlu1 %252, %v16_v0   ;;  %v50_v14 = vsub.s32 1, %v25_v7  ;;  %v54_v15 = vsub.s32 5, %v25_v7  ;;  %v102_v16 = vsub.s32 3, %v25_v7  ;;  %v106_v17 = vsub.s32 7, %v25_v7 }
   0x8   :  { %v27_v18 = vrot.slane %v17_v10, %v26_v8  ;;  %v31_v19 = vrot.slane %v17_v10, %v30_v9  ;;  %v137_v20 = vrot.slane %v241_v11, %v26_v8  ;;  %v141_v21 = vrot.slane %v241_v11, %v30_v9  ;;  %p262_p3 = por %p261_p2, %p260_p1 }
   0x9   :  { %v77_v22 = vrot.slane %v17_v10, %v76_v12  ;;  %v81_v23 = vrot.slane %v17_v10, %v80_v13  ;;  %v179_v24 = vrot.slane %v241_v11, %v76_v12  ;;  %v183_v25 = vrot.slane %v241_v11, %v80_v13 }
   0xa   :  { %v51_v26 = vrot.slane %v17_v10, %v50_v14  ;;  %v55_v27 = vrot.slane %v17_v10, %v54_v15  ;;  %v157_v28 = vrot.slane %v241_v11, %v50_v14  ;;  %v161_v29 = vrot.slane %v241_v11, %v54_v15  ;;  %p263_p4 = pnand %p262_p3, %p256_p0 }
   0xb   :  { %253 = vset.pattern.permute.xlu1 %v279_v1  ;;  %254 = vset.pattern.permute.xlu0 %v279_v1  ;;  %v103_v30 = vrot.slane %v17_v10, %v102_v16  ;;  %v107_v31 = vrot.slane %v17_v10, %v106_v17  ;;  %v201_v32 = vrot.slane %v241_v11, %v102_v16 }
   0xc   :  { %124 = vperm.xlu1 %253, %v15_v5   ;;  %v205_v33 = vrot.slane %v241_v11, %v106_v17  ;;  %v37_v34 = vrot.slane %v27_v18, %v26_v8  ;;  %v41_v35 = vrot.slane %v31_v19, %v26_v8  ;;  %v147_v36 = vrot.slane %v137_v20, %v26_v8 }
   0xd   :  { %v151_v37 = vrot.slane %v141_v21, %v26_v8  ;;  %v87_v40 = vrot.slane %v77_v22, %v76_v12  ;;  %v91_v41 = vrot.slane %v81_v23, %v76_v12  ;;  %v189_v42 = vrot.slane %v179_v24, %v76_v12 }
   0xe   :  { %v193_v43 = vrot.slane %v183_v25, %v76_v12  ;;  %v61_v44 = vrot.slane %v51_v26, %v50_v14  ;;  %v65_v45 = vrot.slane %v55_v27, %v50_v14  ;;  %v167_v46 = vrot.slane %v157_v28, %v50_v14 }
   0xf   :  { %v171_v47 = vrot.slane %v161_v29, %v50_v14  ;;  %v113_v48 = vrot.slane %v103_v30, %v102_v16  ;;  %v117_v49 = vrot.slane %v107_v31, %v102_v16  ;;  %v211_v50 = vrot.slane %v201_v32, %v102_v16 }
  0x10   :  { %v215_v51 = vrot.slane %v205_v33, %v102_v16 }
  0x81   :  { %v21_v38 = vpop.permute.xlu0 %20  ;;  %v72_v39 = vpop.permute.xlu1 %71 }
  0x82   :  { %v42_v52 = vmul.f32 %v37_v34, %v21_v38  ;;  %v43_v53 = vmul.f32 %v41_v35, %v21_v38  ;;  %v152_v54 = vmul.f32 %v147_v36, %v21_v38  ;;  %v153_v55 = vmul.f32 %v151_v37, %v21_v38 }
  0x83   :  { %v92_v56 = vmul.f32 %v87_v40, %v72_v39  ;;  %v93_v57 = vmul.f32 %v91_v41, %v72_v39  ;;  %v194_v58 = vmul.f32 %v189_v42, %v72_v39  ;;  %v195_v59 = vmul.f32 %v193_v43, %v72_v39 }
  0x86   :  { %v46_v60 = vpop.permute.xlu0 %45  ;;  %v98_v61 = vpop.permute.xlu1 %97 }
  0x87   :  { %v66_v62 = vmul.f32 %v61_v44, %v46_v60  ;;  %v67_v63 = vmul.f32 %v65_v45, %v46_v60  ;;  %v172_v0 = vmul.f32 %v167_v46, %v46_v60  ;;  %v173_v1 = vmul.f32 %v171_v47, %v46_v60 }
  0x88   :  { %v118_v2 = vmul.f32 %v113_v48, %v98_v61  ;;  %v119_v3 = vmul.f32 %v117_v49, %v98_v61  ;;  %v216_v4 = vmul.f32 %v211_v50, %v98_v61  ;;  %v217_v5 = vmul.f32 %v215_v51, %v98_v61 }
  0x89   :  { %v68_v6 = vadd.f32 %v66_v62, %v42_v52  ;;  %v69_v7 = vadd.f32 %v67_v63, %v43_v53  ;;  %v174_v8 = vadd.f32 %v172_v0, %v152_v54  ;;  %v175_v9 = vadd.f32 %v173_v1, %v153_v55 }
  0x8b   :  { %v94_v10 = vadd.f32 %v92_v56, %v68_v6  ;;  %v95_v11 = vadd.f32 %v93_v57, %v69_v7  ;;  %v196_v12 = vadd.f32 %v194_v58, %v174_v8  ;;  %v197_v13 = vadd.f32 %v195_v59, %v175_v9  ;;  %v125_v14 = vpop.permute.xlu1 %124 }
  0x8d   :  { %v120_v15 = vadd.f32 %v118_v2, %v94_v10  ;;  %v121_v16 = vadd.f32 %v119_v3, %v95_v11  ;;  %v218_v17 = vadd.f32 %v216_v4, %v196_v12  ;;  %v219_v18 = vadd.f32 %v217_v5, %v197_v13 }
  0x8f   :  { %v127_v19 = vadd.f32 %v125_v14, %v120_v15  ;;  %v128_v20 = vadd.f32 %v125_v14, %v121_v16  ;;  %v220_v21 = vadd.f32 %v218_v17, %v125_v14  ;;  %v221_v22 = vadd.f32 %v219_v18, %v125_v14 }
  0x91   :  { %129 = vst [vmem:[#allocation2] sm:$0xff] %v127_v19  ;;  %130 = vst [vmem:[#allocation2 + $0x8] sm:$0xff] %v128_v20 }
  0x92   :  { %223 = vst [vmem:[#allocation2 + $0x10] sm:$0xff] %v220_v21  ;;  %224 = vst [vmem:[#allocation2 + $0x18] sm:$0xff] %v221_v22 }
  0x93   :  { %266 = shalt.err (!%p263_p4)
}
  0x94   :  { %s267_s22 = scalar_lea.hbm %s333_s3, 512 }
  0x95   :  { %p268_p5 = scmp.ne.s32.totalorder %s333_s3, %s267_s22  ;;  %p271_p6 = scmp.lt.u32.totalorder %s267_s22, %s333_s3 }
  0x97   :  { %p273_p7 = pnand %p271_p6, %p268_p5 }
  0x99   :  { %276 = shalt.err (!%p273_p7)
}
  0x9a   :  { %s284_s27 = smov 256   ;;  %s285_s28 = smov 16  }
  0x9b   :  { %236 = dma.vmem_to_hbm [thread:$0]  %s231_s2, 512, %s333_s3, [#allocation3], %s284_s27, %s284_s27, %s285_s28  }
  0x9c   :  { %277 = dma.done.wait [#allocation3], 512  }
  0x9d   :  { %278 = vsyncadd [#allocation3], 4294966784 }
  0x9e   :  { %240 = vsyncpa [#allocation3], 1 }

</bundles_post_ra>
